<compile_context>
chip_gen: v7x
topology: tpu7x:2x2x1
jax: 0.10.0
libtpu: 0.0.40
codegen_flags: <defaults>
</compile_context>

<pallas_src>
import jax
import jax.numpy as jnp
from jax.experimental import pallas as pl
from jax.experimental.pallas import tpu as pltpu

# ----------------------------------------------------------------------------
# Model hyper-parameters (identical to the PyTorch script)
# ----------------------------------------------------------------------------
embedding_dim = 2
n_hidden = 5
num_classes = 2

sentences = ['i love you', 'he loves me', 'she likes baseball',
             'i hate you', 'sorry for that', 'this is awful']
# sorted() for deterministic vocab order (python set order is not deterministic)
vocab = sorted(set(' '.join(sentences).split()))
word2idx = {w: i for i, w in enumerate(vocab)}
vocab_size = len(word2idx)


# ----------------------------------------------------------------------------
# Fused forward: embedding gather + BiLSTM + attention + FC, one pallas_call
# ----------------------------------------------------------------------------
def bilstm_attention_forward(X, params):
    H, C, E = n_hidden, num_classes, embedding_dim
    B, S = X.shape
    V = params['embedding'].shape[0]
    G = 8 * H                      # 4 gates x 2 directions, gate-major / dir-interleaved
    f32 = jnp.float32
    assert B <= 8, "final-state strided gather below assumes B <= 8"

    # ---------------- host-side weight packing (folds into weight prep under jit) ----
    # Lane layout per gate g in (i,f,g,o): [2gH : 2gH+H] = forward, [2gH+H : 2(g+1)H] = backward
    def interleave(wf, wb):        # [4, D, H] x2 -> [D, 8H]
        return jnp.concatenate(
            [jnp.concatenate([wf[g], wb[g]], axis=-1) for g in range(4)], axis=-1)

    wih = interleave(params['wih_f'], params['wih_b'])          # [E, 8H]
    bias = interleave(params['b_f'], params['b_b'])             # [1, 8H]
    # Token table with the input projection AND bias folded in (one-hot row -> picks it up).
    # NOTE: ids outside [0,V) would give an all-zero row (no bias) — fine for this dataset.
    w_tok = params['embedding'] @ wih + bias                    # [V, 8H]

    # Block-diagonal recurrent weight: h_cat = [h_f | h_b] (2H)  ->  gates (8H)
    zH = jnp.zeros((H, H), f32)
    whh_top = jnp.concatenate(
        [jnp.concatenate([params['whh_f'][g], zH], axis=-1) for g in range(4)], axis=-1)
    whh_bot = jnp.concatenate(
        [jnp.concatenate([zH, params['whh_b'][g]], axis=-1) for g in range(4)], axis=-1)
    whh = jnp.concatenate([whh_top, whh_bot], axis=0)           # [2H, 8H]

    # ONE pre-packed, sublane-stacked, 128-lane slab -> single weight DMA.
    r_whh = V
    r_fcw = V + 2 * H
    r_fcb = V + 4 * H
    rows = ((r_fcb + 1 + 7) // 8) * 8
    slab = jnp.zeros((rows, 128), f32)
    slab = slab.at[0:V, 0:G].set(w_tok)
    slab = slab.at[r_whh:r_whh + 2 * H, 0:G].set(whh)
    slab = slab.at[r_fcw:r_fcw + 2 * H, 0:C].set(params['fc_w'])
    slab = slab.at[r_fcb:r_fcb + 1, 0:C].set(params['fc_b'])

    # ---------------- the fused kernel ------------------------------------------------
    def kernel(x_ref, slab_ref, out_ref, scr_ref):
        # Single-DMA weight slab, carved up with static ref slices (plain loads).
        w_tok_k = slab_ref[0:V, 0:G]                       # [V, 8H] token table (bias folded)
        whh_k = slab_ref[r_whh:r_whh + 2 * H, 0:G]         # [2H, 8H] block-diagonal Whh
        fcw_k = slab_ref[r_fcw:r_fcw + 2 * H, 0:C]         # [2H, C]
        fcb_k = slab_ref[r_fcb:r_fcb + 1, 0:C]             # [1, C]

        def sig(z):
            return 1.0 / (1.0 + jnp.exp(-z))

        # ---- embedding gather + input projection: 1 compare + 1 dot per timestep ----
        lane_v = jax.lax.broadcasted_iota(jnp.int32, (B, V), 1)
        xp = []
        for t in range(S):                                  # S is tiny -> static unroll
            onehot = (lane_v == x_ref[:, t:t + 1]).astype(f32)          # [B, V]
            xp.append(jnp.dot(onehot, w_tok_k, preferred_element_type=f32))  # [B, 8H]

        # ---- fused bidirectional recurrence: ONE dot + ONE gate pass per step -------
        lane_g = jax.lax.broadcasted_iota(jnp.int32, (B, G), 1)
        fwd_gate_lane = (lane_g % (2 * H)) < H              # fwd half of every gate block
        lane_2h = jax.lax.broadcasted_iota(jnp.int32, (B, 2 * H), 1)
        fwd_half = lane_2h < H

        h = jnp.zeros((B, 2 * H), f32)                      # [h_fwd | h_bwd]
        c = jnp.zeros((B, 2 * H), f32)
        h_steps = []
        for k in range(S):
            # forward consumes timestep k, backward consumes timestep S-1-k
            xk = jnp.where(fwd_gate_lane, xp[k], xp[S - 1 - k])          # [B, 8H]
            z = xk + jnp.dot(h, whh_k, preferred_element_type=f32)       # [B, 8H]
            i = sig(z[:, 0:2 * H])
            f = sig(z[:, 2 * H:4 * H])
            g = jnp.tanh(z[:, 4 * H:6 * H])
            o = sig(z[:, 6 * H:8 * H])
            c = f * c + i * g
            h = o * jnp.tanh(c)
            h_steps.append(h)
        # final h: lanes [0:H] = fwd final state, [H:2H] = bwd final state

        # out[t] = [h_fwd(t) | h_bwd(t)]
        outs = [jnp.where(fwd_half, h_steps[t], h_steps[S - 1 - t]) for t in range(S)]

        # ---- torch-bug-compatible hidden = stack([hf, hb]).view(B, 2H) --------------
        # Scatter the final states as the "stacked" [2B, H] layout into VMEM scratch,
        # then de-interleave even/odd rows with strided sublane loads (no MXU traffic).
        scr_ref[0:B, 0:H] = h[:, 0:H]                       # stacked[0:B]   = fwd finals
        scr_ref[B:2 * B, 0:H] = h[:, H:2 * H]               # stacked[B:2B]  = bwd finals
        ga = scr_ref[pl.ds(0, 8, stride=2), :]              # rows 0,2,4,... -> stacked[2b]
        gb = scr_ref[pl.ds(1, 8, stride=2), :]              # rows 1,3,5,... -> stacked[2b+1]
        hid_a = ga[0:B, 0:H]                                # == hidden[:, :H]
        hid_b = gb[0:B, 0:H]                                # == hidden[:, H:]

        # ---- attention scores + softmax (probs computed once, reused below) ---------
        lane_s = jax.lax.broadcasted_iota(jnp.int32, (B, S), 1)
        scores = jnp.zeros((B, S), f32)
        for t in range(S):
            col = jnp.sum(outs[t][:, 0:H] * hid_a + outs[t][:, H:2 * H] * hid_b,
                          axis=-1, keepdims=True)           # [B, 1]
            scores = jnp.where(lane_s == t, col, scores)    # lane-dense [B, S]
        m = jnp.max(scores, axis=-1, keepdims=True)
        e = jnp.exp(scores - m)
        probs = e * (1.0 / jnp.sum(e, axis=-1, keepdims=True))            # [B, S]

        # ---- context + FC head -------------------------------------------------------
        ctx = jnp.zeros((B, 2 * H), f32)
        for t in range(S):
            ctx = ctx + outs[t] * probs[:, t:t + 1]
        logits = jnp.dot(ctx, fcw_k, preferred_element_type=f32) + fcb_k  # [B, C]

        # single lane-dense output block: [logits | attention]
        out_ref[:, 0:C] = logits
        out_ref[:, C:C + S] = probs

    fused = pl.pallas_call(
        kernel,
        out_shape=jax.ShapeDtypeStruct((B, C + S), f32),
        in_specs=[pl.BlockSpec(memory_space=pltpu.MemorySpace.VMEM),
                  pl.BlockSpec(memory_space=pltpu.MemorySpace.VMEM)],
        out_specs=pl.BlockSpec(memory_space=pltpu.MemorySpace.VMEM),
        scratch_shapes=[pltpu.VMEM((16, 128), f32)],
    )(X.astype(jnp.int32), slab)

    logits = fused[:, :C]
    attention = fused[:, C:][..., None]                     # [B, S, 1] (free reshape)
    return logits, attention


# ----------------------------------------------------------------------------
# Pure-JAX reference (mirrors the PyTorch forward semantics)
# ----------------------------------------------------------------------------
def reference_forward(X, p):
    H = n_hidden
    xs = jnp.transpose(p['embedding'][X], (1, 0, 2))         # [S, B, E]
    S, B, _ = xs.shape
    sig = lambda z: 1.0 / (1.0 + jnp.exp(-z))

    def run(wih, whh, b, order):
        h = jnp.zeros((B, H), jnp.float32)
        c = jnp.zeros((B, H), jnp.float32)
        outs = [None] * S
        for t in order:
            x = xs[t]
            i = sig(x @ wih[0] + h @ whh[0] + b[0])
            f = sig(x @ wih[1] + h @ whh[1] + b[1])
            g = jnp.tanh(x @ wih[2] + h @ whh[2] + b[2])
            o = sig(x @ wih[3] + h @ whh[3] + b[3])
            c = f * c + i * g
            h = o * jnp.tanh(c)
            outs[t] = h
        return jnp.stack(outs, 0), h

    of, hf = run(p['wih_f'], p['whh_f'], p['b_f'], range(S))
    ob, hb = run(p['wih_b'], p['whh_b'], p['b_b'], range(S - 1, -1, -1))
    output = jnp.transpose(jnp.concatenate([of, ob], -1), (1, 0, 2))   # [B, S, 2H]
    final = jnp.stack([hf, hb], 0)                                     # [2, B, H]
    hidden = jnp.reshape(final, (B, 2 * H, 1))                         # torch .view bug
    attn_w = output @ hidden                                           # [B, S, 1]
    soft = jax.nn.softmax(attn_w, axis=1)
    context = (jnp.swapaxes(output, 1, 2) @ soft)[..., 0]              # [B, 2H]
    logits = context @ p['fc_w'] + p['fc_b'][0]
    return logits, soft


# ----------------------------------------------------------------------------
# Deterministic parameter init + driver
# ----------------------------------------------------------------------------
def init_params(key):
    ks = jax.random.split(key, 10)
    s = 0.3
    f32 = jnp.float32
    return {
        'embedding': jax.random.normal(ks[0], (vocab_size, embedding_dim), f32),
        'wih_f': s * jax.random.normal(ks[1], (4, embedding_dim, n_hidden), f32),
        'whh_f': s * jax.random.normal(ks[2], (4, n_hidden, n_hidden), f32),
        'b_f':   s * jax.random.normal(ks[3], (4, 1, n_hidden), f32),
        'wih_b': s * jax.random.normal(ks[4], (4, embedding_dim, n_hidden), f32),
        'whh_b': s * jax.random.normal(ks[5], (4, n_hidden, n_hidden), f32),
        'b_b':   s * jax.random.normal(ks[6], (4, 1, n_hidden), f32),
        'fc_w':  s * jax.random.normal(ks[7], (2 * n_hidden, num_classes), f32),
        'fc_b':  s * jax.random.normal(ks[8], (1, num_classes), f32),
    }


if __name__ == "__main__":
    params = init_params(jax.random.PRNGKey(0))

    # X: [batch=6, seq_len=3] word indices, same sentences as the PyTorch script.
    X = jnp.asarray([[word2idx[w] for w in sen.split()] for sen in sentences],
                    dtype=jnp.int32)

    logits, attention = jax.jit(bilstm_attention_forward)(X, params)
    logits = jax.block_until_ready(logits)
    attention = jax.block_until_ready(attention)

    ref_logits, ref_attention = reference_forward(X, params)

    assert logits.shape == (X.shape[0], num_classes)
    assert attention.shape == (X.shape[0], X.shape[1], 1)
    assert jnp.allclose(logits, ref_logits, atol=1e-4, rtol=1e-4)
    assert jnp.allclose(attention, ref_attention, atol=1e-4, rtol=1e-4)

    print("KERNEL_OK")
</pallas_src>

<mosaic_0001>
module attributes {stable_mosaic.version = 11 : i64} {
  func.func @kernel(%arg0: memref<6x3xi32, #tpu.memory_space<vmem>>, %arg1: memref<40x128xf32, #tpu.memory_space<vmem>>, %arg2: memref<6x5xf32, #tpu.memory_space<vmem>>, %arg3: memref<16x128xf32, #tpu.memory_space<vmem>>) attributes {dimension_semantics = [], scalar_prefetch = 0 : i64, scratch_operands = 1 : i64, tpu.core_type = #tpu.core_type<tc>} {
    %c0 = arith.constant 0 : index
    %c0_0 = arith.constant 0 : index
    %0 = vector.load %arg1[%c0, %c0_0] : memref<40x128xf32, #tpu.memory_space<vmem>>, vector<16x40xf32>
    %c16 = arith.constant 16 : index
    %c0_1 = arith.constant 0 : index
    %1 = vector.load %arg1[%c16, %c0_1] : memref<40x128xf32, #tpu.memory_space<vmem>>, vector<10x40xf32>
    %c26 = arith.constant 26 : index
    %c0_2 = arith.constant 0 : index
    %2 = vector.load %arg1[%c26, %c0_2] : memref<40x128xf32, #tpu.memory_space<vmem>>, vector<10x2xf32>
    %c36 = arith.constant 36 : index
    %c0_3 = arith.constant 0 : index
    %3 = vector.load %arg1[%c36, %c0_3] : memref<40x128xf32, #tpu.memory_space<vmem>>, vector<1x2xf32>
    %4 = tpu.iota {dimensions = array<i32: 1>} : vector<6x16xi32>
    %c0_4 = arith.constant 0 : index
    %c0_5 = arith.constant 0 : index
    %5 = vector.load %arg0[%c0_4, %c0_5] : memref<6x3xi32, #tpu.memory_space<vmem>>, vector<6x1xi32>
    %6 = vector.broadcast %5 : vector<6x1xi32> to vector<6x16xi32>
    %7 = arith.cmpi eq, %4, %6 : vector<6x16xi32>
    %8 = arith.extui %7 : vector<6x16xi1> to vector<6x16xi32>
    %9 = arith.sitofp %8 : vector<6x16xi32> to vector<6x16xf32>
    %cst = arith.constant dense<0.000000e+00> : vector<6x40xf32>
    %10 = tpu.matmul %9, %0, %cst {dimension_numbers = #tpu.dot_dimension_numbers<[1], [0], [0], [1], [0, 0, 1, 1], [], []>} : vector<6x16xf32>, vector<16x40xf32>, vector<6x40xf32> -> vector<6x40xf32>
    %c0_6 = arith.constant 0 : index
    %c1 = arith.constant 1 : index
    %11 = vector.load %arg0[%c0_6, %c1] : memref<6x3xi32, #tpu.memory_space<vmem>>, vector<6x1xi32>
    %12 = vector.broadcast %11 : vector<6x1xi32> to vector<6x16xi32>
    %13 = arith.cmpi eq, %4, %12 : vector<6x16xi32>
    %14 = arith.extui %13 : vector<6x16xi1> to vector<6x16xi32>
    %15 = arith.sitofp %14 : vector<6x16xi32> to vector<6x16xf32>
    %cst_7 = arith.constant dense<0.000000e+00> : vector<6x40xf32>
    %16 = tpu.matmul %15, %0, %cst_7 {dimension_numbers = #tpu.dot_dimension_numbers<[1], [0], [0], [1], [0, 0, 1, 1], [], []>} : vector<6x16xf32>, vector<16x40xf32>, vector<6x40xf32> -> vector<6x40xf32>
    %c0_8 = arith.constant 0 : index
    %c2 = arith.constant 2 : index
    %17 = vector.load %arg0[%c0_8, %c2] : memref<6x3xi32, #tpu.memory_space<vmem>>, vector<6x1xi32>
    %18 = vector.broadcast %17 : vector<6x1xi32> to vector<6x16xi32>
    %19 = arith.cmpi eq, %4, %18 : vector<6x16xi32>
    %20 = arith.extui %19 : vector<6x16xi1> to vector<6x16xi32>
    %21 = arith.sitofp %20 : vector<6x16xi32> to vector<6x16xf32>
    %cst_9 = arith.constant dense<0.000000e+00> : vector<6x40xf32>
    %22 = tpu.matmul %21, %0, %cst_9 {dimension_numbers = #tpu.dot_dimension_numbers<[1], [0], [0], [1], [0, 0, 1, 1], [], []>} : vector<6x16xf32>, vector<16x40xf32>, vector<6x40xf32> -> vector<6x40xf32>
    %23 = tpu.iota {dimensions = array<i32: 1>} : vector<6x40xi32>
    %c10_i32 = arith.constant 10 : i32
    %c0_i32 = arith.constant 0 : i32
    %24 = arith.cmpi eq, %c10_i32, %c0_i32 : i32
    %c1_i32 = arith.constant 1 : i32
    %25 = arith.select %24, %c1_i32, %c10_i32 : i32
    %26 = vector.broadcast %25 : i32 to vector<6x40xi32>
    %27 = arith.remsi %23, %26 : vector<6x40xi32>
    %c0_i32_10 = arith.constant 0 : i32
    %28 = vector.broadcast %c0_i32_10 : i32 to vector<6x40xi32>
    %29 = arith.cmpi ne, %27, %28 : vector<6x40xi32>
    %c0_i32_11 = arith.constant 0 : i32
    %30 = vector.broadcast %c0_i32_11 : i32 to vector<6x40xi32>
    %31 = arith.cmpi slt, %27, %30 : vector<6x40xi32>
    %c0_i32_12 = arith.constant 0 : i32
    %32 = arith.cmpi slt, %25, %c0_i32_12 : i32
    %33 = vector.broadcast %32 : i1 to vector<6x40xi1>
    %34 = vector.broadcast %33 : vector<6x40xi1> to vector<6x40xi1>
    %35 = arith.xori %31, %34 : vector<6x40xi1>
    %36 = arith.andi %35, %29 : vector<6x40xi1>
    %37 = vector.broadcast %25 : i32 to vector<6x40xi32>
    %38 = arith.addi %27, %37 : vector<6x40xi32>
    %39 = arith.select %36, %38, %27 : vector<6x40xi1>, vector<6x40xi32>
    %c5_i32 = arith.constant 5 : i32
    %40 = vector.broadcast %c5_i32 : i32 to vector<6x40xi32>
    %41 = arith.cmpi slt, %39, %40 : vector<6x40xi32>
    %42 = tpu.iota {dimensions = array<i32: 1>} : vector<6x10xi32>
    %c5_i32_13 = arith.constant 5 : i32
    %43 = vector.broadcast %c5_i32_13 : i32 to vector<6x10xi32>
    %44 = arith.cmpi slt, %42, %43 : vector<6x10xi32>
    %cst_14 = arith.constant 0.000000e+00 : f32
    %45 = vector.broadcast %cst_14 : f32 to vector<6x10xf32>
    %cst_15 = arith.constant 0.000000e+00 : f32
    %46 = vector.broadcast %cst_15 : f32 to vector<6x10xf32>
    %47 = arith.select %41, %10, %22 : vector<6x40xi1>, vector<6x40xf32>
    %cst_16 = arith.constant dense<0.000000e+00> : vector<6x40xf32>
    %48 = tpu.matmul %45, %1, %cst_16 {dimension_numbers = #tpu.dot_dimension_numbers<[1], [0], [0], [1], [0, 0, 1, 1], [], []>} : vector<6x10xf32>, vector<10x40xf32>, vector<6x40xf32> -> vector<6x40xf32>
    %49 = arith.addf %47, %48 : vector<6x40xf32>
    %50 = vector.extract_strided_slice %49 {offsets = [0, 0], sizes = [6, 10], strides = [1, 1]} : vector<6x40xf32> to vector<6x10xf32>
    %cst_17 = arith.constant 0.000000e+00 : f32
    %51 = vector.broadcast %cst_17 : f32 to vector<6x10xf32>
    %52 = arith.subf %51, %50 : vector<6x10xf32>
    %53 = math.exp %52 : vector<6x10xf32>
    %cst_18 = arith.constant 1.000000e+00 : f32
    %54 = vector.broadcast %cst_18 : f32 to vector<6x10xf32>
    %55 = arith.addf %54, %53 : vector<6x10xf32>
    %cst_19 = arith.constant 1.000000e+00 : f32
    %56 = vector.broadcast %cst_19 : f32 to vector<6x10xf32>
    %57 = arith.divf %56, %55 : vector<6x10xf32>
    %58 = vector.extract_strided_slice %49 {offsets = [0, 10], sizes = [6, 10], strides = [1, 1]} : vector<6x40xf32> to vector<6x10xf32>
    %cst_20 = arith.constant 0.000000e+00 : f32
    %59 = vector.broadcast %cst_20 : f32 to vector<6x10xf32>
    %60 = arith.subf %59, %58 : vector<6x10xf32>
    %61 = math.exp %60 : vector<6x10xf32>
    %cst_21 = arith.constant 1.000000e+00 : f32
    %62 = vector.broadcast %cst_21 : f32 to vector<6x10xf32>
    %63 = arith.addf %62, %61 : vector<6x10xf32>
    %cst_22 = arith.constant 1.000000e+00 : f32
    %64 = vector.broadcast %cst_22 : f32 to vector<6x10xf32>
    %65 = arith.divf %64, %63 : vector<6x10xf32>
    %66 = vector.extract_strided_slice %49 {offsets = [0, 20], sizes = [6, 10], strides = [1, 1]} : vector<6x40xf32> to vector<6x10xf32>
    %67 = math.tanh %66 : vector<6x10xf32>
    %68 = vector.extract_strided_slice %49 {offsets = [0, 30], sizes = [6, 10], strides = [1, 1]} : vector<6x40xf32> to vector<6x10xf32>
    %cst_23 = arith.constant 0.000000e+00 : f32
    %69 = vector.broadcast %cst_23 : f32 to vector<6x10xf32>
    %70 = arith.subf %69, %68 : vector<6x10xf32>
    %71 = math.exp %70 : vector<6x10xf32>
    %cst_24 = arith.constant 1.000000e+00 : f32
    %72 = vector.broadcast %cst_24 : f32 to vector<6x10xf32>
    %73 = arith.addf %72, %71 : vector<6x10xf32>
    %cst_25 = arith.constant 1.000000e+00 : f32
    %74 = vector.broadcast %cst_25 : f32 to vector<6x10xf32>
    %75 = arith.divf %74, %73 : vector<6x10xf32>
    %76 = arith.mulf %65, %46 : vector<6x10xf32>
    %77 = arith.mulf %57, %67 : vector<6x10xf32>
    %78 = arith.addf %76, %77 : vector<6x10xf32>
    %79 = math.tanh %78 : vector<6x10xf32>
    %80 = arith.mulf %75, %79 : vector<6x10xf32>
    %81 = arith.select %41, %16, %16 : vector<6x40xi1>, vector<6x40xf32>
    %cst_26 = arith.constant dense<0.000000e+00> : vector<6x40xf32>
    %82 = tpu.matmul %80, %1, %cst_26 {dimension_numbers = #tpu.dot_dimension_numbers<[1], [0], [0], [1], [0, 0, 1, 1], [], []>} : vector<6x10xf32>, vector<10x40xf32>, vector<6x40xf32> -> vector<6x40xf32>
    %83 = arith.addf %81, %82 : vector<6x40xf32>
    %84 = vector.extract_strided_slice %83 {offsets = [0, 0], sizes = [6, 10], strides = [1, 1]} : vector<6x40xf32> to vector<6x10xf32>
    %cst_27 = arith.constant 0.000000e+00 : f32
    %85 = vector.broadcast %cst_27 : f32 to vector<6x10xf32>
    %86 = arith.subf %85, %84 : vector<6x10xf32>
    %87 = math.exp %86 : vector<6x10xf32>
    %cst_28 = arith.constant 1.000000e+00 : f32
    %88 = vector.broadcast %cst_28 : f32 to vector<6x10xf32>
    %89 = arith.addf %88, %87 : vector<6x10xf32>
    %cst_29 = arith.constant 1.000000e+00 : f32
    %90 = vector.broadcast %cst_29 : f32 to vector<6x10xf32>
    %91 = arith.divf %90, %89 : vector<6x10xf32>
    %92 = vector.extract_strided_slice %83 {offsets = [0, 10], sizes = [6, 10], strides = [1, 1]} : vector<6x40xf32> to vector<6x10xf32>
    %cst_30 = arith.constant 0.000000e+00 : f32
    %93 = vector.broadcast %cst_30 : f32 to vector<6x10xf32>
    %94 = arith.subf %93, %92 : vector<6x10xf32>
    %95 = math.exp %94 : vector<6x10xf32>
    %cst_31 = arith.constant 1.000000e+00 : f32
    %96 = vector.broadcast %cst_31 : f32 to vector<6x10xf32>
    %97 = arith.addf %96, %95 : vector<6x10xf32>
    %cst_32 = arith.constant 1.000000e+00 : f32
    %98 = vector.broadcast %cst_32 : f32 to vector<6x10xf32>
    %99 = arith.divf %98, %97 : vector<6x10xf32>
    %100 = vector.extract_strided_slice %83 {offsets = [0, 20], sizes = [6, 10], strides = [1, 1]} : vector<6x40xf32> to vector<6x10xf32>
    %101 = math.tanh %100 : vector<6x10xf32>
    %102 = vector.extract_strided_slice %83 {offsets = [0, 30], sizes = [6, 10], strides = [1, 1]} : vector<6x40xf32> to vector<6x10xf32>
    %cst_33 = arith.constant 0.000000e+00 : f32
    %103 = vector.broadcast %cst_33 : f32 to vector<6x10xf32>
    %104 = arith.subf %103, %102 : vector<6x10xf32>
    %105 = math.exp %104 : vector<6x10xf32>
    %cst_34 = arith.constant 1.000000e+00 : f32
    %106 = vector.broadcast %cst_34 : f32 to vector<6x10xf32>
    %107 = arith.addf %106, %105 : vector<6x10xf32>
    %cst_35 = arith.constant 1.000000e+00 : f32
    %108 = vector.broadcast %cst_35 : f32 to vector<6x10xf32>
    %109 = arith.divf %108, %107 : vector<6x10xf32>
    %110 = arith.mulf %99, %78 : vector<6x10xf32>
    %111 = arith.mulf %91, %101 : vector<6x10xf32>
    %112 = arith.addf %110, %111 : vector<6x10xf32>
    %113 = math.tanh %112 : vector<6x10xf32>
    %114 = arith.mulf %109, %113 : vector<6x10xf32>
    %115 = arith.select %41, %22, %10 : vector<6x40xi1>, vector<6x40xf32>
    %cst_36 = arith.constant dense<0.000000e+00> : vector<6x40xf32>
    %116 = tpu.matmul %114, %1, %cst_36 {dimension_numbers = #tpu.dot_dimension_numbers<[1], [0], [0], [1], [0, 0, 1, 1], [], []>} : vector<6x10xf32>, vector<10x40xf32>, vector<6x40xf32> -> vector<6x40xf32>
    %117 = arith.addf %115, %116 : vector<6x40xf32>
    %118 = vector.extract_strided_slice %117 {offsets = [0, 0], sizes = [6, 10], strides = [1, 1]} : vector<6x40xf32> to vector<6x10xf32>
    %cst_37 = arith.constant 0.000000e+00 : f32
    %119 = vector.broadcast %cst_37 : f32 to vector<6x10xf32>
    %120 = arith.subf %119, %118 : vector<6x10xf32>
    %121 = math.exp %120 : vector<6x10xf32>
    %cst_38 = arith.constant 1.000000e+00 : f32
    %122 = vector.broadcast %cst_38 : f32 to vector<6x10xf32>
    %123 = arith.addf %122, %121 : vector<6x10xf32>
    %cst_39 = arith.constant 1.000000e+00 : f32
    %124 = vector.broadcast %cst_39 : f32 to vector<6x10xf32>
    %125 = arith.divf %124, %123 : vector<6x10xf32>
    %126 = vector.extract_strided_slice %117 {offsets = [0, 10], sizes = [6, 10], strides = [1, 1]} : vector<6x40xf32> to vector<6x10xf32>
    %cst_40 = arith.constant 0.000000e+00 : f32
    %127 = vector.broadcast %cst_40 : f32 to vector<6x10xf32>
    %128 = arith.subf %127, %126 : vector<6x10xf32>
    %129 = math.exp %128 : vector<6x10xf32>
    %cst_41 = arith.constant 1.000000e+00 : f32
    %130 = vector.broadcast %cst_41 : f32 to vector<6x10xf32>
    %131 = arith.addf %130, %129 : vector<6x10xf32>
    %cst_42 = arith.constant 1.000000e+00 : f32
    %132 = vector.broadcast %cst_42 : f32 to vector<6x10xf32>
    %133 = arith.divf %132, %131 : vector<6x10xf32>
    %134 = vector.extract_strided_slice %117 {offsets = [0, 20], sizes = [6, 10], strides = [1, 1]} : vector<6x40xf32> to vector<6x10xf32>
    %135 = math.tanh %134 : vector<6x10xf32>
    %136 = vector.extract_strided_slice %117 {offsets = [0, 30], sizes = [6, 10], strides = [1, 1]} : vector<6x40xf32> to vector<6x10xf32>
    %cst_43 = arith.constant 0.000000e+00 : f32
    %137 = vector.broadcast %cst_43 : f32 to vector<6x10xf32>
    %138 = arith.subf %137, %136 : vector<6x10xf32>
    %139 = math.exp %138 : vector<6x10xf32>
    %cst_44 = arith.constant 1.000000e+00 : f32
    %140 = vector.broadcast %cst_44 : f32 to vector<6x10xf32>
    %141 = arith.addf %140, %139 : vector<6x10xf32>
    %cst_45 = arith.constant 1.000000e+00 : f32
    %142 = vector.broadcast %cst_45 : f32 to vector<6x10xf32>
    %143 = arith.divf %142, %141 : vector<6x10xf32>
    %144 = arith.mulf %133, %112 : vector<6x10xf32>
    %145 = arith.mulf %125, %135 : vector<6x10xf32>
    %146 = arith.addf %144, %145 : vector<6x10xf32>
    %147 = math.tanh %146 : vector<6x10xf32>
    %148 = arith.mulf %143, %147 : vector<6x10xf32>
    %149 = arith.select %44, %80, %148 : vector<6x10xi1>, vector<6x10xf32>
    %150 = arith.select %44, %114, %114 : vector<6x10xi1>, vector<6x10xf32>
    %151 = arith.select %44, %148, %80 : vector<6x10xi1>, vector<6x10xf32>
    %152 = vector.extract_strided_slice %148 {offsets = [0, 0], sizes = [6, 5], strides = [1, 1]} : vector<6x10xf32> to vector<6x5xf32>
    %c0_46 = arith.constant 0 : index
    %c0_47 = arith.constant 0 : index
    %153 = vector.load %arg3[%c0_46, %c0_47] : memref<16x128xf32, #tpu.memory_space<vmem>>, vector<6x5xf32>
    tpu.vector_store %arg3[%c0_46, %c0_47], %152 {strides = array<i32>} : memref<16x128xf32, #tpu.memory_space<vmem>>, vector<6x5xf32>,
    %154 = vector.extract_strided_slice %148 {offsets = [0, 5], sizes = [6, 5], strides = [1, 1]} : vector<6x10xf32> to vector<6x5xf32>
    %c6 = arith.constant 6 : index
    %c0_48 = arith.constant 0 : index
    %155 = vector.load %arg3[%c6, %c0_48] : memref<16x128xf32, #tpu.memory_space<vmem>>, vector<6x5xf32>
    tpu.vector_store %arg3[%c6, %c0_48], %154 {strides = array<i32>} : memref<16x128xf32, #tpu.memory_space<vmem>>, vector<6x5xf32>,
    %c0_49 = arith.constant 0 : index
    %c0_50 = arith.constant 0 : index
    %156 = tpu.strided_load %arg3[%c0_49, %c0_50] {strides = array<i32: 2, 1>} : memref<16x128xf32, #tpu.memory_space<vmem>>, vector<8x128xf32>
    %c1_51 = arith.constant 1 : index
    %c0_52 = arith.constant 0 : index
    %157 = tpu.strided_load %arg3[%c1_51, %c0_52] {strides = array<i32: 2, 1>} : memref<16x128xf32, #tpu.memory_space<vmem>>, vector<8x128xf32>
    %158 = vector.extract_strided_slice %156 {offsets = [0, 0], sizes = [6, 5], strides = [1, 1]} : vector<8x128xf32> to vector<6x5xf32>
    %159 = vector.extract_strided_slice %157 {offsets = [0, 0], sizes = [6, 5], strides = [1, 1]} : vector<8x128xf32> to vector<6x5xf32>
    %160 = tpu.iota {dimensions = array<i32: 1>} : vector<6x3xi32>
    %cst_53 = arith.constant 0.000000e+00 : f32
    %161 = vector.broadcast %cst_53 : f32 to vector<6x3xf32>
    %162 = vector.extract_strided_slice %149 {offsets = [0, 0], sizes = [6, 5], strides = [1, 1]} : vector<6x10xf32> to vector<6x5xf32>
    %163 = arith.mulf %162, %158 : vector<6x5xf32>
    %164 = vector.extract_strided_slice %149 {offsets = [0, 5], sizes = [6, 5], strides = [1, 1]} : vector<6x10xf32> to vector<6x5xf32>
    %165 = arith.mulf %164, %159 : vector<6x5xf32>
    %166 = arith.addf %163, %165 : vector<6x5xf32>
    %cst_54 = arith.constant dense<0.000000e+00> : vector<6xf32>
    %167 = vector.multi_reduction <add>, %166, %cst_54 [1] : vector<6x5xf32> to vector<6xf32>
    %168 = vector.shape_cast %167 : vector<6xf32> to vector<6x1xf32>
    %c0_i32_55 = arith.constant 0 : i32
    %169 = vector.broadcast %c0_i32_55 : i32 to vector<6x3xi32>
    %170 = arith.cmpi eq, %160, %169 : vector<6x3xi32>
    %171 = vector.shape_cast %168 : vector<6x1xf32> to vector<6x1xf32>
    %172 = vector.broadcast %171 : vector<6x1xf32> to vector<6x3xf32>
    %173 = arith.select %170, %172, %161 : vector<6x3xi1>, vector<6x3xf32>
    %174 = vector.extract_strided_slice %150 {offsets = [0, 0], sizes = [6, 5], strides = [1, 1]} : vector<6x10xf32> to vector<6x5xf32>
    %175 = arith.mulf %174, %158 : vector<6x5xf32>
    %176 = vector.extract_strided_slice %150 {offsets = [0, 5], sizes = [6, 5], strides = [1, 1]} : vector<6x10xf32> to vector<6x5xf32>
    %177 = arith.mulf %176, %159 : vector<6x5xf32>
    %178 = arith.addf %175, %177 : vector<6x5xf32>
    %cst_56 = arith.constant dense<0.000000e+00> : vector<6xf32>
    %179 = vector.multi_reduction <add>, %178, %cst_56 [1] : vector<6x5xf32> to vector<6xf32>
    %180 = vector.shape_cast %179 : vector<6xf32> to vector<6x1xf32>
    %c1_i32_57 = arith.constant 1 : i32
    %181 = vector.broadcast %c1_i32_57 : i32 to vector<6x3xi32>
    %182 = arith.cmpi eq, %160, %181 : vector<6x3xi32>
    %183 = vector.shape_cast %180 : vector<6x1xf32> to vector<6x1xf32>
    %184 = vector.broadcast %183 : vector<6x1xf32> to vector<6x3xf32>
    %185 = arith.select %182, %184, %173 : vector<6x3xi1>, vector<6x3xf32>
    %186 = vector.extract_strided_slice %151 {offsets = [0, 0], sizes = [6, 5], strides = [1, 1]} : vector<6x10xf32> to vector<6x5xf32>
    %187 = arith.mulf %186, %158 : vector<6x5xf32>
    %188 = vector.extract_strided_slice %151 {offsets = [0, 5], sizes = [6, 5], strides = [1, 1]} : vector<6x10xf32> to vector<6x5xf32>
    %189 = arith.mulf %188, %159 : vector<6x5xf32>
    %190 = arith.addf %187, %189 : vector<6x5xf32>
    %cst_58 = arith.constant dense<0.000000e+00> : vector<6xf32>
    %191 = vector.multi_reduction <add>, %190, %cst_58 [1] : vector<6x5xf32> to vector<6xf32>
    %192 = vector.shape_cast %191 : vector<6xf32> to vector<6x1xf32>
    %c2_i32 = arith.constant 2 : i32
    %193 = vector.broadcast %c2_i32 : i32 to vector<6x3xi32>
    %194 = arith.cmpi eq, %160, %193 : vector<6x3xi32>
    %195 = vector.shape_cast %192 : vector<6x1xf32> to vector<6x1xf32>
    %196 = vector.broadcast %195 : vector<6x1xf32> to vector<6x3xf32>
    %197 = arith.select %194, %196, %185 : vector<6x3xi1>, vector<6x3xf32>
    %cst_59 = arith.constant dense<0xFF800000> : vector<6xf32>
    %198 = vector.multi_reduction <maximumf>, %197, %cst_59 [1] : vector<6x3xf32> to vector<6xf32>
    %199 = vector.shape_cast %198 : vector<6xf32> to vector<6x1xf32>
    %200 = vector.broadcast %199 : vector<6x1xf32> to vector<6x3xf32>
    %201 = arith.subf %197, %200 : vector<6x3xf32>
    %202 = math.exp %201 : vector<6x3xf32>
    %cst_60 = arith.constant dense<0.000000e+00> : vector<6xf32>
    %203 = vector.multi_reduction <add>, %202, %cst_60 [1] : vector<6x3xf32> to vector<6xf32>
    %204 = vector.shape_cast %203 : vector<6xf32> to vector<6x1xf32>
    %cst_61 = arith.constant 1.000000e+00 : f32
    %205 = vector.broadcast %cst_61 : f32 to vector<6x1xf32>
    %206 = arith.divf %205, %204 : vector<6x1xf32>
    %207 = vector.broadcast %206 : vector<6x1xf32> to vector<6x3xf32>
    %208 = arith.mulf %202, %207 : vector<6x3xf32>
    %cst_62 = arith.constant 0.000000e+00 : f32
    %209 = vector.broadcast %cst_62 : f32 to vector<6x10xf32>
    %210 = vector.extract_strided_slice %208 {offsets = [0, 0], sizes = [6, 1], strides = [1, 1]} : vector<6x3xf32> to vector<6x1xf32>
    %211 = vector.broadcast %210 : vector<6x1xf32> to vector<6x10xf32>
    %212 = arith.mulf %149, %211 : vector<6x10xf32>
    %213 = arith.addf %209, %212 : vector<6x10xf32>
    %214 = vector.extract_strided_slice %208 {offsets = [0, 1], sizes = [6, 1], strides = [1, 1]} : vector<6x3xf32> to vector<6x1xf32>
    %215 = vector.broadcast %214 : vector<6x1xf32> to vector<6x10xf32>
    %216 = arith.mulf %150, %215 : vector<6x10xf32>
    %217 = arith.addf %213, %216 : vector<6x10xf32>
    %218 = vector.extract_strided_slice %208 {offsets = [0, 2], sizes = [6, 1], strides = [1, 1]} : vector<6x3xf32> to vector<6x1xf32>
    %219 = vector.broadcast %218 : vector<6x1xf32> to vector<6x10xf32>
    %220 = arith.mulf %151, %219 : vector<6x10xf32>
    %221 = arith.addf %217, %220 : vector<6x10xf32>
    %cst_63 = arith.constant dense<0.000000e+00> : vector<6x2xf32>
    %222 = tpu.matmul %221, %2, %cst_63 {dimension_numbers = #tpu.dot_dimension_numbers<[1], [0], [0], [1], [0, 0, 1, 1], [], []>} : vector<6x10xf32>, vector<10x2xf32>, vector<6x2xf32> -> vector<6x2xf32>
    %223 = vector.broadcast %3 : vector<1x2xf32> to vector<6x2xf32>
    %224 = arith.addf %222, %223 : vector<6x2xf32>
    %c0_64 = arith.constant 0 : index
    %c0_65 = arith.constant 0 : index
    %225 = vector.load %arg2[%c0_64, %c0_65] : memref<6x5xf32, #tpu.memory_space<vmem>>, vector<6x2xf32>
    tpu.vector_store %arg2[%c0_64, %c0_65], %224 {strides = array<i32>} : memref<6x5xf32, #tpu.memory_space<vmem>>, vector<6x2xf32>,
    %c0_66 = arith.constant 0 : index
    %c2_67 = arith.constant 2 : index
    %226 = vector.load %arg2[%c0_66, %c2_67] : memref<6x5xf32, #tpu.memory_space<vmem>>, vector<6x3xf32>
    tpu.vector_store %arg2[%c0_66, %c2_67], %208 {strides = array<i32>} : memref<6x5xf32, #tpu.memory_space<vmem>>, vector<6x3xf32>,
    return
  }
}

</mosaic_0001>

<bundles_post_ra>
// kernel: bilstm_attention_forward.1
= control target key start
LH: loop header
LB: loop body
LE: loop exit
PB: predicated region body
PF: predicated region fallthrough
CT: control target
= control target key end

     0   :  { %v940_v0 = vmov 0   ;;  %v941_v2 = vmov 0.0|0.0   ;;  %vm942_vm0 = vmmov 0   ;;  %v943_v6 = vmov 0.0   ;;  %s946_s18 = smov 108   ;;  %s947_s19 = smov 10   ;;  %s1124_s0 = inlined_call_operand.vmem [shape: s32[6,3], index: 0, kind: input, shape index: {}]   ;;  %s1125_s1 = inlined_call_operand.vmem [shape: f32[40,128], index: 1, kind: input, shape index: {}]   ;;  %s1126_s2 = inlined_call_operand.vmem [shape: f32[6,5], index: 2, kind: output, shape index: {}]  }
   0x1   :  { %905 = vset.pattern.permute.xlu0 %v940_v0  ;;  %v976_v1 = vld [vmem:[%s1124_s0] sm:$0x3f]  ;;  %859 = vmatprep.subr.bf16.mxu0 %v941_v2  ;;  %v12_v4 = vld [vmem:[%s1125_s1 + $0x8] sm:$0xff]  ;;  %v944_v7 = vmov 2   ;;  %v18_v8 = vlaneseq  ;;  %v13_v10 = vld [vmem:[%s1125_s1 + $0x10] sm:$0xff]  ;;  %vm209_vm1 = vcmask 1041408  }
   0x2   :  { %v11_v3 = vld [vmem:[%s1125_s1] sm:$0xff]  ;;  %22 = vperm.xlu0 %905, %v976_v1   ;;  %862 = vmatprep.subr.bf16.mxu1 %v941_v2  ;;  %v14_v11 = vld [vmem:[%s1125_s1 + $0x18] sm:$0x3]  ;;  %vm27_vm2 = vcmask 130048   ;;  %vm945_vm4 = vmmov 1   ;;  %v948_v43 = vmov 1  }
   0x3   :  { %v985_v5 = vpack.c.bf16 %v12_v4, %v11_v3  ;;  %814 = vmatprep.mubr.msk.f32.mxu0 %vm942_vm0, %v943_v6  ;;  %821 = vmatprep.mubr.msk.f32.mxu1 %vm942_vm0, %v943_v6  ;;  %v995_v9 = vand.u32 127, %v18_v8  ;;  %v866_v13 = vpack.c.bf16 %v14_v11, %v13_v10  ;;  %vm1004_vm5 = vmpackc.low %vm209_vm1, %vm945_vm4  ;;  %s949_s20 = smov 20   ;;  %s950_s21 = smov 98   ;;  %vm205_vm11 = vcmask 80896   ;;  %v786_v14 = vld [vmem:[%s1125_s1 + $0x24] ss:$0 sm:$0xff] }
   0x4   :  { %908 = vset.pattern.permute.xlu1 %v948_v43  ;;  %s951_s22 = smov 93   ;;  %vm588_vm13 = vcmask 37888   ;;  %s952_s23 = smov 5   ;;  %vm769_vm4 = vcmask 37904  }
   0x5   :  { %861 = vmatpush3.bf16.msra.mxu0 %v985_v5  ;;  %864 = vmatpush3.bf16.msra.mxu1 %v985_v5  ;;  %v1027_v18 = vmul.u32.u64.low 3435973837, %v995_v9  ;;  %v1028_v19 = vmul.u32.u64.high 3435973837, %v995_v9, %v1027_v18  ;;  %s953_s24 = smov 35   ;;  %s954_s25 = smov 30   ;;  %vm203_vm14 = vcmp.lt.s32.totalorder %v995_v9, 5  ;;  %vm611_vm15 = vcmp.eq.s32.totalorder %v995_v9, 0 }
   0x6   :  { %865 = vmatprep.subr.bf16.mxu0 %v941_v2  ;;  %869 = vmatprep.subr.bf16.mxu1 %v941_v2  ;;  %s955_s26 = smov 123   ;;  %vm646_vm1 = vcmp.eq.s32.totalorder %v995_v9, 2  ;;  %s956_s3 = smov 2  }
   0x7   :  { %906 = vset.pattern.permute.xlu0 %v944_v7  ;;  %v192_v20 = vshrl.u32 %v1028_v19, 3 }
   0x8   :  { %108 = vperm.xlu0 %906, %v976_v1  }
   0x9   :  { %v193_v21 = vmul.u32 10, %v192_v20 }
   0xb   :  { %v194_v22 = vsub.s32 %v995_v9, %v193_v21 }
   0xc   :  { %907 = vset.pattern.permute.xlu0 %v948_v43 }
   0xd   :  { %vm197_vm7 = vcmp.ne.s32.totalorder %v194_v22, 0  ;;  %vm198_vm8 = vcmp.lt.s32.totalorder %v194_v22, 0  ;;  %v200_v23 = vadd.s32 10, %v194_v22  ;;  %102 = vperm.xlu0 %907, %v976_v1  }
   0xe   :  { %vm199_vm9 = vmand %vm198_vm8, %vm197_vm7 }
   0xf   :  { %v201_v25 = vsel %vm199_vm9, %v200_v23, %v194_v22 }
  0x10   :  { %vm1034_vm10 = vcmp.lt.s32.totalorder %v201_v25, 5 }
  0x11   :  { %909 = vset.pattern.permute.xlu0 %v940_v0 }
  0x81   :  { %v23_v12 = vpop.permute.xlu0 %22 }
  0x82   :  { %vm24_vm3 = vcmp.eq.s32.totalorder %v995_v9, %v23_v12 }
  0x83   :  { %v775_v15 = vsel %vm24_vm3, 1.0, %v943_v6  ;;  %vm764_vm3 = vcmask 13312  }
  0x84   :  { %815 = vmatmul.mubr.msk.f32.vlgmr.msra.gmra.mrb[0].mxu0 %vm27_vm2, %v775_v15 }
  0x85   :  { %868 = vmatpush3.bf16.msk.msra.mxu0 %vm1004_vm5, %v866_v13  ;;  %828 = vmatprep.mubr.msk.f32.mxu0 %vm942_vm0, %v943_v6 }
  0x86   :  { %876 = vmatprep.subr.bf16.mxu0 %v941_v2 }
  0x87   :  { %v109_v16 = vpop.permute.xlu0 %108 }
  0x88   :  { %vm110_vm6 = vcmp.eq.s32.totalorder %v995_v9, %v109_v16  ;;  %829 = vmatmul.mubr.f32.vlgmr.msra.gmra.mrb[2].mxu0 %v943_v6 }
  0x89   :  { %v778_v17 = vsel %vm110_vm6, 1.0, %v943_v6  ;;  %879 = vmatpush3.bf16.msk.msra.mxu0 %vm1004_vm5, %v866_v13  ;;  %849 = vmatprep.mubr.msk.f32.mxu0 %vm942_vm0, %v943_v6 }
  0x8a   :  { %822 = vmatmul.mubr.msk.f32.vlgmr.msra.gmra.mrb[0].mxu1 %vm27_vm2, %v778_v17  ;;  %880 = vmatprep.subr.bf16.mxu0 %v941_v2 }
  0x8b   :  { %872 = vmatpush3.bf16.msk.msra.mxu1 %vm1004_vm5, %v866_v13  ;;  %835 = vmatprep.mubr.msk.f32.mxu1 %vm942_vm0, %v943_v6 }
  0x8c   :  { %873 = vmatprep.subr.bf16.mxu1 %v941_v2  ;;  %v103_v51 = vpop.permute.xlu0 %102 }
  0x8d   :  { %vm104_vm12 = vcmp.eq.s32.totalorder %v995_v9, %v103_v51 }
  0x8e   :  { %v777_v52 = vsel %vm104_vm12, 1.0, %v943_v6 }
 0x157   :  { %v1032_v24 = vpop.f32.mrb[0].mxu0 }
 0x158   :  { %v816_v26 = vpop.f32.mrb[1].mxu0 }
 0x15b   :  { %v279_v28 = vpop.f32.mrb[2].mxu0 }
 0x15c   :  { %v830_v30 = vpop.f32.mrb[3].mxu0 }
 0x15d   :  { %v1038_v29 = vpop.f32.mrb[0].mxu1 }
 0x15e   :  { %v204_v31 = vsel %vm1034_vm10, %v1032_v24, %v1038_v29  ;;  %v823_v32 = vpop.f32.mrb[1].mxu1  ;;  %v480_v33 = vsel %vm1034_vm10, %v1038_v29, %v1032_v24 }
 0x15f   :  { %v283_v34 = vadd.f32 %v279_v28, %v204_v31 }
 0x161   :  { %912 = vtanh.f32 %v283_v34  ;;  %v284_v36 = vsub.f32 0.0, %v283_v34 }
 0x163   :  { %v285_v37 = vmul.f32 1.442695, %v284_v36 }
 0x165   :  { %914 = vpow2.f32 %v285_v37 }
 0x16b   :  { %v913_v35 = vpop.eup %912 }
 0x16c   :  { %293 = vrot.lane.b32.xlu1 %v913_v35, %s946_s18 }
 0x16f   :  { %v915_v38 = vpop.eup %914 }
 0x170   :  { %v287_v39 = vadd.f32 1.0, %v915_v38 }
 0x172   :  { %916 = vrcp.f32 %v287_v39 }
 0x17c   :  { %v917_v40 = vpop.eup %916 }
 0x17d   :  { %v291_v44 = vmul.f32 0.0, %v917_v40 }
 0x1de   :  { %v294_v41 = vpop.permute.xlu1 %293 }
 0x1df   :  { %v296_v42 = vmul.f32 %v917_v40, %v294_v41 }
 0x1e1   :  { %298 = vrot.lane.b32.xlu1 %v296_v42, %s947_s19 }
 0x253   :  { %v299_v45 = vpop.permute.xlu1 %298 }
 0x254   :  { %v301_v46 = vadd.f32 %v299_v45, %v291_v44 }
 0x256   :  { %918 = vtanh.f32 %v301_v46 }
 0x260   :  { %v919_v47 = vpop.eup %918 }
 0x261   :  { %304 = vrot.lane.b32.xlu1 %v919_v47, %s949_s20 }
 0x2d3   :  { %v305_v48 = vpop.permute.xlu1 %304 }
 0x2d4   :  { %v307_v49 = vmul.f32 %v917_v40, %v305_v48 }
 0x2d6   :  { %309 = vrot.lane.b32.xlu1 %v307_v49, %s950_s21 }
 0x348   :  { %v1054_v50 = vpop.permute.xlu1 %309 }
 0x349   :  { %836 = vmatmul.mubr.msk.f32.vlgmr.msra.gmra.mrb[2].mxu1 %vm205_vm11, %v1054_v50 }
 0x34a   :  { %875 = vmatpush3.bf16.msra.mxu1 %v985_v5  ;;  %842 = vmatprep.mubr.msk.f32.mxu1 %vm942_vm0, %v943_v6 }
 0x351   :  { %843 = vmatmul.mubr.msk.f32.vlgmr.msra.gmra.mrb[2].mxu1 %vm27_vm2, %v777_v52  ;;  %vm648_vm2 = vcmask 21504  }
 0x424   :  { %v452_v53 = vpop.f32.mrb[2].mxu1 }
 0x425   :  { %920 = vtanh.f32 %v452_v53  ;;  %v844_v54 = vpop.f32.mrb[3].mxu1  ;;  %v456_v56 = vsub.f32 0.0, %v452_v53 }
 0x427   :  { %v457_v57 = vmul.f32 1.442695, %v456_v56 }
 0x429   :  { %922 = vpow2.f32 %v457_v57 }
 0x42f   :  { %v921_v55 = vpop.eup %920 }
 0x430   :  { %465 = vrot.lane.b32.xlu1 %v921_v55, %s946_s18 }
 0x433   :  { %v923_v58 = vpop.eup %922 }
 0x434   :  { %v459_v59 = vadd.f32 1.0, %v923_v58 }
 0x436   :  { %924 = vrcp.f32 %v459_v59 }
 0x440   :  { %v925_v60 = vpop.eup %924 }
 0x441   :  { %v463_v63 = vmul.f32 %v925_v60, %v301_v46 }
 0x4a2   :  { %v466_v61 = vpop.permute.xlu1 %465 }
 0x4a3   :  { %v468_v62 = vmul.f32 %v925_v60, %v466_v61 }
 0x4a5   :  { %470 = vrot.lane.b32.xlu0 %v468_v62, %s947_s19 }
 0x517   :  { %v471_v0 = vpop.permute.xlu0 %470 }
 0x518   :  { %v473_v1 = vadd.f32 %v471_v0, %v463_v63 }
 0x51a   :  { %926 = vtanh.f32 %v473_v1 }
 0x524   :  { %v927_v2 = vpop.eup %926 }
 0x525   :  { %476 = vrot.lane.b32.xlu1 %v927_v2, %s949_s20  ;;  %v16_v2 = vld [vmem:[%s1125_s1 + $0x22] sm:$0x3] }
 0x597   :  { %v477_v3 = vpop.permute.xlu1 %476 }
 0x598   :  { %v1067_v4 = vmul.f32 %v925_v60, %v477_v3 }
 0x59a   :  { %482 = vrot.lane.b32.xlu0 %v1067_v4, %s950_s21 }
 0x60c   :  { %v483_v5 = vpop.permute.xlu0 %482 }
 0x60d   :  { %850 = vmatmul.mubr.msk.f32.vlgmr.msra.gmra.mrb[4].mxu0 %vm205_vm11, %v483_v5 }
 0x60e   :  { %856 = vmatprep.mubr.msk.f32.mxu0 %vm942_vm0, %v943_v6  ;;  %vm634_vm0 = vcmp.eq.s32.totalorder %v995_v9, 1  ;;  %v15_v9 = vld [vmem:[%s1125_s1 + $0x1a] sm:$0xff] }
 0x60f   :  { %v881_v3 = vpack.c.bf16 %v16_v2, %v15_v9 }
 0x611   :  { %883 = vmatpush3.bf16.msk.msra.mxu0 %vm1004_vm5, %v881_v3 }
 0x6e0   :  { %v552_v8 = vpop.f32.mrb[4].mxu0 }
 0x6e1   :  { %v556_v10 = vadd.f32 %v552_v8, %v480_v33  ;;  %v851_v11 = vpop.f32.mrb[5].mxu0 }
 0x6e3   :  { %928 = vtanh.f32 %v556_v10  ;;  %v557_v13 = vsub.f32 0.0, %v556_v10 }
 0x6e5   :  { %v558_v15 = vmul.f32 1.442695, %v557_v13 }
 0x6e7   :  { %930 = vpow2.f32 %v558_v15 }
 0x6ed   :  { %v929_v12 = vpop.eup %928 }
 0x6ee   :  { %566 = vrot.lane.b32.xlu1 %v929_v12, %s946_s18 }
 0x6f1   :  { %v931_v16 = vpop.eup %930 }
 0x6f2   :  { %v560_v17 = vadd.f32 1.0, %v931_v16 }
 0x6f4   :  { %932 = vrcp.f32 %v560_v17 }
 0x6fe   :  { %v933_v18 = vpop.eup %932 }
 0x6ff   :  { %v564_v20 = vmul.f32 %v933_v18, %v473_v1 }
 0x760   :  { %v567_v6 = vpop.permute.xlu1 %566 }
 0x761   :  { %v569_v19 = vmul.f32 %v933_v18, %v567_v6 }
 0x763   :  { %571 = vrot.lane.b32.xlu0 %v569_v19, %s947_s19 }
 0x7d5   :  { %v572_v21 = vpop.permute.xlu0 %571 }
 0x7d6   :  { %v574_v22 = vadd.f32 %v572_v21, %v564_v20 }
 0x7d8   :  { %934 = vtanh.f32 %v574_v22 }
 0x7e2   :  { %v935_v23 = vpop.eup %934 }
 0x7e3   :  { %577 = vrot.lane.b32.xlu1 %v935_v23, %s949_s20 }
 0x855   :  { %v578_v24 = vpop.permute.xlu1 %577 }
 0x856   :  { %v580_v25 = vmul.f32 %v933_v18, %v578_v24 }
 0x858   :  { %590 = vrot.lane.b32.xlu1 %v580_v25, %s951_s22  ;;  %583 = vrot.lane.b32.xlu0 %v580_v25, %s950_s21 }
 0x8ca   :  { %v591_v26 = vpop.permute.xlu1 %590  ;;  %v584_v27 = vpop.permute.xlu0 %583 }
 0x8cb   :  { %593 = vst.msk [vmem:[#allocation2 + $0x6] sm:$0x3f] %vm588_vm13, %v591_v26  ;;  %589 = vst.msk [vmem:[#allocation2] sm:$0x3f] %vm588_vm13, %v584_v27  ;;  %v1087_v30 = vsel %vm203_vm14, %v1054_v50, %v584_v27  ;;  %v587_v35 = vsel %vm203_vm14, %v584_v27, %v1054_v50 }
 0x8d2   :  { %v596_v28 = vld [vmem:[#allocation2 + $0x1] ss:$2 sm:$0xff]  ;;  %v594_v29 = vld [vmem:[#allocation2] ss:$2 sm:$0xff] }
 0x8d3   :  { %599 = vrot.lane.b32.xlu1 %v596_v28, %s952_s23  ;;  %618 = vrot.lane.b32.xlu0 %v596_v28, %s953_s24  ;;  %v597_v39 = vmul.f32 %v594_v29, %v1087_v30  ;;  %v636_v46 = vmul.f32 %v594_v29, %v587_v35 }
 0x8d7   :  { %614 = vrot.lane.b32.xlu0 %v594_v29, %s954_s25 }
 0x945   :  { %v600_v31 = vpop.permute.xlu1 %599  ;;  %v619_v32 = vpop.permute.xlu0 %618 }
 0x946   :  { %v602_v33 = vmul.f32 %v600_v31, %v1087_v30  ;;  %v621_v34 = vmul.f32 %v619_v32, %v1067_v4  ;;  %v637_v36 = vmul.f32 %v600_v31, %v587_v35 }
 0x948   :  { %623 = vrot.lane.b32.xlu1 %v621_v34, %s955_s26  ;;  %604 = vrot.lane.b32.xlu0 %v602_v33, %s955_s26 }
 0x949   :  { %v615_v37 = vpop.permute.xlu0 %614 }
 0x94a   :  { %v617_v38 = vmul.f32 %v615_v37, %v1067_v4 }
 0x94c   :  { %639 = vrot.lane.b32.xlu1 %v637_v36, %s955_s26 }
 0x9ba   :  { %v624_v40 = vpop.permute.xlu1 %623  ;;  %v605_v41 = vpop.permute.xlu0 %604 }
 0x9bb   :  { %v626_v42 = vadd.f32 %v624_v40, %v617_v38  ;;  %v607_v43 = vadd.f32 %v605_v41, %v597_v39 }
 0x9bd   :  { %628 = vrot.lane.b32.xlu0 %v626_v42, %s950_s21  ;;  %v608_v44 = vsel %vm588_vm13, %v607_v43, 0.0 }
 0x9be   :  { %609 = vadd.xlane.f32.xlu1 %v608_v44  ;;  %v640_v45 = vpop.permute.xlu1 %639 }
 0x9bf   :  { %v642_v48 = vadd.f32 %v640_v45, %v636_v46 }
 0x9c1   :  { %v643_v50 = vsel %vm588_vm13, %v642_v48, 0.0 }
 0xa2f   :  { %v629_v47 = vpop.permute.xlu0 %628 }
 0xa30   :  { %v631_v49 = vsel %vm588_vm13, %v629_v47, 0.0 }
 0xa31   :  { %632 = vadd.xlane.f32.xlu0 %v631_v49 }
 0xa35   :  { %644 = vadd.xlane.f32.xlu0 %v643_v50 }
 0xa4b   :  { %v610_v51 = vpop.xlane.xlu1 %609 }
 0xa4c   :  { %v612_v53 = vsel %vm611_vm15, %v610_v51, 0.0 }
 0xabe   :  { %v633_v52 = vpop.xlane.xlu0 %632 }
 0xabf   :  { %v635_v54 = vsel %vm634_vm0, %v633_v52, %v612_v53 }
 0xac2   :  { %v645_v55 = vpop.xlane.xlu0 %644 }
 0xac3   :  { %v647_v56 = vsel %vm646_vm1, %v645_v55, %v635_v54 }
 0xac4   :  { %v649_v57 = vsel %vm648_vm2, %v647_v56, -inf }
 0xac5   :  { %650 = vmax.xlane.f32.xlu1 %v649_v57 }
 0xb52   :  { %v651_v58 = vpop.xlane.xlu1 %650 }
 0xb53   :  { %v652_v59 = vsub.f32 %v647_v56, %v651_v58 }
 0xb55   :  { %v653_v60 = vmul.f32 1.442695, %v652_v59 }
 0xb57   :  { %936 = vpow2.f32 %v653_v60 }
 0xb61   :  { %v937_v61 = vpop.eup %936 }
 0xb62   :  { %v655_v62 = vsel %vm648_vm2, %v937_v61, 0.0 }
 0xb63   :  { %656 = vadd.xlane.f32.xlu0 %v655_v62 }
 0xbf0   :  { %v657_v63 = vpop.xlane.xlu0 %656 }
 0xbf1   :  { %938 = vrcp.f32 %v657_v63 }
 0xbfb   :  { %v939_v0 = vpop.eup %938 }
 0xbfc   :  { %v660_v1 = vmul.f32 %v939_v0, %v937_v61 }
 0xbfe   :  { %663 = vperm.xlu0 %909, %v660_v1   ;;  %669 = vperm.xlu1 %908, %v660_v1  }
 0xc02   :  { %910 = vset.pattern.permute.xlu1 %v944_v7  ;;  %911 = vset.pattern.permute.xlu0 %v944_v7 }
 0xc03   :  { %679 = vperm.xlu1 %910, %v660_v1  }
 0xc7d   :  { %v670_v5 = vpop.permute.xlu1 %669  ;;  %v664_v7 = vpop.permute.xlu0 %663 }
 0xc7e   :  { %v672_v8 = vmul.f32 %v670_v5, %v1067_v4  ;;  %v666_v11 = vmul.f32 %v664_v7, %v1087_v30 }
 0xc80   :  { %674 = vrot.lane.b32.xlu1 %v672_v8, %s950_s21 }
 0xc82   :  { %v680_v10 = vpop.permute.xlu1 %679 }
 0xc83   :  { %v682_v13 = vmul.f32 %v680_v10, %v587_v35 }
 0xc84   :  { %766 = vrot.lane.b32.xlu1 %v660_v1, %s956_s3 }
 0xcf2   :  { %v675_v12 = vpop.permute.xlu1 %674 }
 0xcf3   :  { %v677_v15 = vadd.f32 %v675_v12, %v666_v11 }
 0xcf5   :  { %v683_v16 = vadd.f32 %v682_v13, %v677_v15 }
 0xcf6   :  { %v767_v6 = vpop.permute.xlu1 %766 }
 0xcf7   :  { %857 = vmatmul.mubr.msk.f32.vlgmr.msra.gmra.mrb[6].mxu0 %vm205_vm11, %v683_v16 }
 0xdca   :  { %v760_v17 = vpop.f32.mrb[6].mxu0 }
 0xdcb   :  { %v761_v4 = vadd.f32 %v786_v14, %v760_v17  ;;  %v858_v18 = vpop.f32.mrb[7].mxu0 }
 0xdcd   :  { %765 = vst.msk [vmem:[%s1126_s2] sm:$0x3f] %vm764_vm3, %v761_v4 }
 0xdce   :  { %770 = vst.msk [vmem:[%s1126_s2] sm:$0x3f] %vm769_vm4, %v767_v6 }

</bundles_post_ra>
